<compile_context>
chip_gen: v7x
topology: tpu7x:2x2x1
jax: 0.10.0
libtpu: 0.0.40
codegen_flags: <defaults>
</compile_context>

<pallas_src>
import functools

import jax
import jax.numpy as jnp
from jax import lax
from jax.experimental import pallas as pl
from jax.experimental.pallas import tpu as pltpu

KH = KW = 3


def resblock_des_kernel(x_ref, w0_ref, b0_ref, w1_ref, b1_ref, m_ref, out_ref,
                        *, C, W, L):
    # x_ref  : (1, C, L)   f32   TB images folded into the lane dim (L = TB*H*W)
    # w*_ref : (9, C, C)   f32   per-tap weight matrices W_t[co, ci], t = ky*3+kx
    # b*_ref : (C, 1)      f32
    # m_ref  : (9, L)      f32   per-tap validity masks (1.0 valid / 0.0 halo)
    # out_ref: (1, C, L)   f32   lane-dense output (L multiple of 128)
    x = x_ref[0]                                           # (C, L) f32
    masks = m_ref[...]                                     # (9, L), resident (const index_map)
    mask_rows = [masks[t:t + 1, :] for t in range(KH * KW)]  # hoisted; reused by both convs

    def conv3x3(a, w_ref, b_ref):
        """Zero-padded 3x3 conv of a (C, L) f32 slab as 9 tap-wise MXU matmuls."""
        # Bias folded into the f32 accumulator init (one lane-broadcast per conv).
        acc = jnp.broadcast_to(b_ref[...], (C, L)).astype(jnp.float32)
        for t in range(KH * KW):
            ky, kx = divmod(t, KW)
            d = (ky - 1) * W + (kx - 1)
            # Lane rotation (XLU) stands in for the 1-pixel halo; invalid
            # (out-of-image / cross-image) lanes are zeroed by the mask.
            shifted = pltpu.roll(a, shift=(-d) % L, axis=1) if d != 0 else a
            # Center tap is always valid -> skip the mask multiply.
            patch = shifted if d == 0 else shifted * mask_rows[t]
            # bf16 MXU operands, f32 accumulate.
            acc = acc + jnp.dot(w_ref[t].astype(jnp.bfloat16),
                                patch.astype(jnp.bfloat16),
                                preferred_element_type=jnp.float32)
        return acc

    a0 = jnp.maximum(x, 0.0)                               # ReLU(x), f32 (VPU)
    h = jnp.maximum(conv3x3(a0, w0_ref, b0_ref), 0.0)      # ReLU(conv0), f32
    y = conv3x3(h, w1_ref, b1_ref)                         # conv1, f32
    out_ref[0] = y + x                                     # identity bypass


def _pick_tb(N, C, HW, max_block_bytes=4 << 20):
    """Largest batch-fold TB dividing N that keeps >=2 grid steps (v7x megacore)
    and a modest per-step f32 activation block (VMEM headroom on v7x's 64 MiB)."""
    best = 1
    for tb in range(1, N + 1):
        if N % tb:
            continue
        if N >= 2 and N // tb < 2:
            continue
        if tb * HW * C * 4 > max_block_bytes:
            continue
        best = tb
    return best


def resblock_des(x_nchw, w0_oihw, b0, w1_oihw, b1, *, tb=None):
    """ResBlockDes forward, stride=1 path.  x: (N, C, H, W) f32."""
    N, Cin, H, W = x_nchw.shape
    Cout = w0_oihw.shape[0]
    assert Cin == Cout, "stride=1 identity bypass requires in_channels == out_channels"
    HW = H * W
    assert HW % 128 == 0, "flattened spatial must be lane-aligned (multiple of 128)"

    if tb is None:
        tb = _pick_tb(N, Cin, HW)
    assert N % tb == 0
    G = N // tb
    L = tb * HW

    # Fold TB images into the lane (minor) dim: (G, C, TB*HW).
    x_grp = (x_nchw.reshape(G, tb, Cin, HW)
                   .transpose(0, 2, 1, 3)
                   .reshape(G, Cin, L))

    # Per-tap weight matrices W_t[co, ci] = w[co, ci, ky, kx], t = ky*3 + kx.
    w0_tap = jnp.transpose(w0_oihw, (2, 3, 0, 1)).reshape(KH * KW, Cout, Cin)
    w1_tap = jnp.transpose(w1_oihw, (2, 3, 0, 1)).reshape(KH * KW, Cout, Cout)
    b0_col = b0.reshape(Cout, 1).astype(jnp.float32)
    b1_col = b1.reshape(Cout, 1).astype(jnp.float32)

    # Per-tap validity masks, periodic per folded image (== 3x3 zero padding).
    col = jnp.arange(L, dtype=jnp.int32)
    pix = col % HW                      # position within one image
    xc = pix % W                        # x coordinate within a row
    rows = []
    for ky in range(KH):
        dy = ky - 1
        for kx in range(KW):
            dx = kx - 1
            valid = jnp.ones((L,), dtype=bool)
            if dx == -1:
                valid = valid & (xc != 0)
            elif dx == 1:
                valid = valid & (xc != W - 1)
            if dy == -1:
                valid = valid & (pix >= W)
            elif dy == 1:
                valid = valid & (pix < (H - 1) * W)
            rows.append(valid)
    mask = jnp.stack(rows, axis=0).astype(jnp.float32)     # (9, L)

    kernel = functools.partial(resblock_des_kernel, C=Cin, W=W, L=L)
    out = pl.pallas_call(
        kernel,
        out_shape=jax.ShapeDtypeStruct((G, Cout, L), jnp.float32),
        grid_spec=pltpu.PrefetchScalarGridSpec(
            num_scalar_prefetch=0,
            grid=(G,),
            in_specs=[
                pl.BlockSpec((1, Cin, L), lambda g: (g, 0, 0)),
                pl.BlockSpec((KH * KW, Cout, Cin), lambda g: (0, 0, 0)),
                pl.BlockSpec((Cout, 1), lambda g: (0, 0)),
                pl.BlockSpec((KH * KW, Cout, Cout), lambda g: (0, 0, 0)),
                pl.BlockSpec((Cout, 1), lambda g: (0, 0)),
                pl.BlockSpec((KH * KW, L), lambda g: (0, 0)),
            ],
            out_specs=pl.BlockSpec((1, Cout, L), lambda g: (g, 0, 0)),
        ),
        compiler_params=pltpu.CompilerParams(
            dimension_semantics=("parallel",),
            vmem_limit_bytes=32 * 1024 * 1024,
        ),
    )(x_grp, w0_tap, b0_col, w1_tap, b1_col, mask)

    return (out.reshape(G, Cout, tb, HW)
               .transpose(0, 2, 1, 3)
               .reshape(N, Cout, H, W))


# ---------------- glue: SpectralNorm (standard SNGAN wrapper semantics) ----------------
def spectral_norm_weight(w_oihw, key, n_power_iterations=1, eps=1e-12):
    cout = w_oihw.shape[0]
    w_mat = w_oihw.reshape(cout, -1)
    u = jax.random.normal(key, (cout,), dtype=w_oihw.dtype)
    u = u / (jnp.linalg.norm(u) + eps)
    v = None
    for _ in range(n_power_iterations):
        v = w_mat.T @ u
        v = v / (jnp.linalg.norm(v) + eps)
        u = w_mat @ v
        u = u / (jnp.linalg.norm(u) + eps)
    sigma = u @ (w_mat @ v)
    return w_oihw / sigma


# ---------------- matched-precision pure-JAX reference ----------------
def ref_resblock(x, w0_oihw, b0, w1_oihw, b1):
    """Reference with the same numerics as the kernel: bf16 conv operands,
    f32 accumulation, f32 bias / ReLU / residual."""
    dn = ("NCHW", "OIHW", "NCHW")

    def conv(a, w, b):
        y = lax.conv_general_dilated(
            a.astype(jnp.bfloat16), w.astype(jnp.bfloat16), (1, 1), ((1, 1), (1, 1)),
            dimension_numbers=dn, preferred_element_type=jnp.float32)
        return y + b[None, :, None, None]

    a0 = jnp.maximum(x, 0.0)
    h = jnp.maximum(conv(a0, w0_oihw, b0), 0.0)
    return conv(h, w1_oihw, b1) + x  # identity bypass (stride=1)


if __name__ == "__main__":
    key = jax.random.PRNGKey(0)
    ks = jax.random.split(key, 8)

    N, C, H, W = 2, 4, 16, 16  # in_channels == out_channels == 4, stride=1
    x = jax.random.normal(ks[0], (N, C, H, W), dtype=jnp.float32)

    fan_in = C * KH * KW
    bound = 1.0 / (fan_in ** 0.5)
    w0_oihw = jax.random.uniform(ks[1], (C, C, KH, KW), minval=-bound, maxval=bound,
                                 dtype=jnp.float32)
    b0 = jax.random.uniform(ks[2], (C,), minval=-bound, maxval=bound, dtype=jnp.float32)
    w1_oihw = jax.random.uniform(ks[3], (C, C, KH, KW), minval=-bound, maxval=bound,
                                 dtype=jnp.float32)
    b1 = jax.random.uniform(ks[4], (C,), minval=-bound, maxval=bound, dtype=jnp.float32)

    # SpectralNorm forward-time weight normalization (one power iteration).
    w0_sn = spectral_norm_weight(w0_oihw, ks[5])
    w1_sn = spectral_norm_weight(w1_oihw, ks[6])

    out = resblock_des(x, w0_sn, b0, w1_sn, b1)
    out = jax.block_until_ready(out)

    ref = ref_resblock(x, w0_sn, b0, w1_sn, b1)
    max_err = float(jnp.max(jnp.abs(out - ref)))
    assert jnp.allclose(out, ref, atol=1e-2, rtol=1e-2), f"max_err={max_err}"

    print("KERNEL_OK")
</pallas_src>

<mosaic_0001>
module attributes {stable_mosaic.version = 11 : i64} {
  func.func @resblock_des_kernel(%arg0: i32, %arg1: memref<1x4x256xf32, #tpu.memory_space<vmem>>, %arg2: memref<9x4x4xf32, #tpu.memory_space<vmem>>, %arg3: memref<4x1xf32, #tpu.memory_space<vmem>>, %arg4: memref<9x4x4xf32, #tpu.memory_space<vmem>>, %arg5: memref<4x1xf32, #tpu.memory_space<vmem>>, %arg6: memref<9x256xf32, #tpu.memory_space<vmem>>, %arg7: memref<1x4x256xf32, #tpu.memory_space<vmem>>) attributes {dimension_semantics = [#tpu.dimension_semantics<parallel>], iteration_bounds = array<i64: 2>, scalar_prefetch = 0 : i64, scratch_operands = 0 : i64, tpu.core_type = #tpu.core_type<tc>, window_params = [{transform_indices = @transform_0, window_bounds = array<i64: 1, 4, 256>}, {pipeline_mode = #tpu.pipeline_mode<synchronous>, transform_indices = @transform_1, window_bounds = array<i64: 9, 4, 4>}, {pipeline_mode = #tpu.pipeline_mode<synchronous>, transform_indices = @transform_2, window_bounds = array<i64: 4, 1>}, {pipeline_mode = #tpu.pipeline_mode<synchronous>, transform_indices = @transform_3, window_bounds = array<i64: 9, 4, 4>}, {pipeline_mode = #tpu.pipeline_mode<synchronous>, transform_indices = @transform_4, window_bounds = array<i64: 4, 1>}, {pipeline_mode = #tpu.pipeline_mode<synchronous>, transform_indices = @transform_5, window_bounds = array<i64: 9, 256>}, {transform_indices = @transform_6, window_bounds = array<i64: 1, 4, 256>}]} {
    %c0 = arith.constant 0 : index
    %c0_0 = arith.constant 0 : index
    %c0_1 = arith.constant 0 : index
    %0 = vector.load %arg1[%c0, %c0_0, %c0_1] : memref<1x4x256xf32, #tpu.memory_space<vmem>>, vector<1x4x256xf32>
    %1 = vector.shape_cast %0 : vector<1x4x256xf32> to vector<4x256xf32>
    %c0_2 = arith.constant 0 : index
    %c0_3 = arith.constant 0 : index
    %2 = vector.load %arg6[%c0_2, %c0_3] : memref<9x256xf32, #tpu.memory_space<vmem>>, vector<9x256xf32>
    %3 = vector.extract_strided_slice %2 {offsets = [0, 0], sizes = [1, 256], strides = [1, 1]} : vector<9x256xf32> to vector<1x256xf32>
    %4 = vector.extract_strided_slice %2 {offsets = [1, 0], sizes = [1, 256], strides = [1, 1]} : vector<9x256xf32> to vector<1x256xf32>
    %5 = vector.extract_strided_slice %2 {offsets = [2, 0], sizes = [1, 256], strides = [1, 1]} : vector<9x256xf32> to vector<1x256xf32>
    %6 = vector.extract_strided_slice %2 {offsets = [3, 0], sizes = [1, 256], strides = [1, 1]} : vector<9x256xf32> to vector<1x256xf32>
    %7 = vector.extract_strided_slice %2 {offsets = [5, 0], sizes = [1, 256], strides = [1, 1]} : vector<9x256xf32> to vector<1x256xf32>
    %8 = vector.extract_strided_slice %2 {offsets = [6, 0], sizes = [1, 256], strides = [1, 1]} : vector<9x256xf32> to vector<1x256xf32>
    %9 = vector.extract_strided_slice %2 {offsets = [7, 0], sizes = [1, 256], strides = [1, 1]} : vector<9x256xf32> to vector<1x256xf32>
    %10 = vector.extract_strided_slice %2 {offsets = [8, 0], sizes = [1, 256], strides = [1, 1]} : vector<9x256xf32> to vector<1x256xf32>
    %cst = arith.constant 0.000000e+00 : f32
    %11 = vector.broadcast %cst : f32 to vector<4x256xf32>
    %12 = arith.maximumf %1, %11 : vector<4x256xf32>
    %c0_4 = arith.constant 0 : index
    %c0_5 = arith.constant 0 : index
    %13 = vector.load %arg3[%c0_4, %c0_5] : memref<4x1xf32, #tpu.memory_space<vmem>>, vector<4x1xf32>
    %14 = vector.shape_cast %13 : vector<4x1xf32> to vector<4x1xf32>
    %15 = vector.broadcast %14 : vector<4x1xf32> to vector<4x256xf32>
    %c17_i32 = arith.constant 17 : i32
    %16 = tpu.dynamic_rotate %12 by %c17_i32 dim 1 : vector<4x256xf32>, i32 -> vector<4x256xf32>
    %17 = vector.broadcast %3 : vector<1x256xf32> to vector<4x256xf32>
    %18 = arith.mulf %16, %17 : vector<4x256xf32>
    %c0_6 = arith.constant 0 : index
    %c0_7 = arith.constant 0 : index
    %c0_8 = arith.constant 0 : index
    %19 = vector.load %arg2[%c0_6, %c0_7, %c0_8] : memref<9x4x4xf32, #tpu.memory_space<vmem>>, vector<1x4x4xf32>
    %20 = vector.shape_cast %19 : vector<1x4x4xf32> to vector<4x4xf32>
    %21 = arith.truncf %20 : vector<4x4xf32> to vector<4x4xbf16>
    %22 = arith.truncf %18 : vector<4x256xf32> to vector<4x256xbf16>
    %cst_9 = arith.constant dense<0.000000e+00> : vector<4x256xf32>
    %23 = tpu.matmul %21, %22, %cst_9 {dimension_numbers = #tpu.dot_dimension_numbers<[1], [0], [0], [1], [0, 0, 1, 1], [], []>} : vector<4x4xbf16>, vector<4x256xbf16>, vector<4x256xf32> -> vector<4x256xf32>
    %24 = arith.addf %15, %23 : vector<4x256xf32>
    %c16_i32 = arith.constant 16 : i32
    %25 = tpu.dynamic_rotate %12 by %c16_i32 dim 1 : vector<4x256xf32>, i32 -> vector<4x256xf32>
    %26 = vector.broadcast %4 : vector<1x256xf32> to vector<4x256xf32>
    %27 = arith.mulf %25, %26 : vector<4x256xf32>
    %c1 = arith.constant 1 : index
    %c0_10 = arith.constant 0 : index
    %c0_11 = arith.constant 0 : index
    %28 = vector.load %arg2[%c1, %c0_10, %c0_11] : memref<9x4x4xf32, #tpu.memory_space<vmem>>, vector<1x4x4xf32>
    %29 = vector.shape_cast %28 : vector<1x4x4xf32> to vector<4x4xf32>
    %30 = arith.truncf %29 : vector<4x4xf32> to vector<4x4xbf16>
    %31 = arith.truncf %27 : vector<4x256xf32> to vector<4x256xbf16>
    %cst_12 = arith.constant dense<0.000000e+00> : vector<4x256xf32>
    %32 = tpu.matmul %30, %31, %cst_12 {dimension_numbers = #tpu.dot_dimension_numbers<[1], [0], [0], [1], [0, 0, 1, 1], [], []>} : vector<4x4xbf16>, vector<4x256xbf16>, vector<4x256xf32> -> vector<4x256xf32>
    %33 = arith.addf %24, %32 : vector<4x256xf32>
    %c15_i32 = arith.constant 15 : i32
    %34 = tpu.dynamic_rotate %12 by %c15_i32 dim 1 : vector<4x256xf32>, i32 -> vector<4x256xf32>
    %35 = vector.broadcast %5 : vector<1x256xf32> to vector<4x256xf32>
    %36 = arith.mulf %34, %35 : vector<4x256xf32>
    %c2 = arith.constant 2 : index
    %c0_13 = arith.constant 0 : index
    %c0_14 = arith.constant 0 : index
    %37 = vector.load %arg2[%c2, %c0_13, %c0_14] : memref<9x4x4xf32, #tpu.memory_space<vmem>>, vector<1x4x4xf32>
    %38 = vector.shape_cast %37 : vector<1x4x4xf32> to vector<4x4xf32>
    %39 = arith.truncf %38 : vector<4x4xf32> to vector<4x4xbf16>
    %40 = arith.truncf %36 : vector<4x256xf32> to vector<4x256xbf16>
    %cst_15 = arith.constant dense<0.000000e+00> : vector<4x256xf32>
    %41 = tpu.matmul %39, %40, %cst_15 {dimension_numbers = #tpu.dot_dimension_numbers<[1], [0], [0], [1], [0, 0, 1, 1], [], []>} : vector<4x4xbf16>, vector<4x256xbf16>, vector<4x256xf32> -> vector<4x256xf32>
    %42 = arith.addf %33, %41 : vector<4x256xf32>
    %c1_i32 = arith.constant 1 : i32
    %43 = tpu.dynamic_rotate %12 by %c1_i32 dim 1 : vector<4x256xf32>, i32 -> vector<4x256xf32>
    %44 = vector.broadcast %6 : vector<1x256xf32> to vector<4x256xf32>
    %45 = arith.mulf %43, %44 : vector<4x256xf32>
    %c3 = arith.constant 3 : index
    %c0_16 = arith.constant 0 : index
    %c0_17 = arith.constant 0 : index
    %46 = vector.load %arg2[%c3, %c0_16, %c0_17] : memref<9x4x4xf32, #tpu.memory_space<vmem>>, vector<1x4x4xf32>
    %47 = vector.shape_cast %46 : vector<1x4x4xf32> to vector<4x4xf32>
    %48 = arith.truncf %47 : vector<4x4xf32> to vector<4x4xbf16>
    %49 = arith.truncf %45 : vector<4x256xf32> to vector<4x256xbf16>
    %cst_18 = arith.constant dense<0.000000e+00> : vector<4x256xf32>
    %50 = tpu.matmul %48, %49, %cst_18 {dimension_numbers = #tpu.dot_dimension_numbers<[1], [0], [0], [1], [0, 0, 1, 1], [], []>} : vector<4x4xbf16>, vector<4x256xbf16>, vector<4x256xf32> -> vector<4x256xf32>
    %51 = arith.addf %42, %50 : vector<4x256xf32>
    %c4 = arith.constant 4 : index
    %c0_19 = arith.constant 0 : index
    %c0_20 = arith.constant 0 : index
    %52 = vector.load %arg2[%c4, %c0_19, %c0_20] : memref<9x4x4xf32, #tpu.memory_space<vmem>>, vector<1x4x4xf32>
    %53 = vector.shape_cast %52 : vector<1x4x4xf32> to vector<4x4xf32>
    %54 = arith.truncf %53 : vector<4x4xf32> to vector<4x4xbf16>
    %55 = arith.truncf %12 : vector<4x256xf32> to vector<4x256xbf16>
    %cst_21 = arith.constant dense<0.000000e+00> : vector<4x256xf32>
    %56 = tpu.matmul %54, %55, %cst_21 {dimension_numbers = #tpu.dot_dimension_numbers<[1], [0], [0], [1], [0, 0, 1, 1], [], []>} : vector<4x4xbf16>, vector<4x256xbf16>, vector<4x256xf32> -> vector<4x256xf32>
    %57 = arith.addf %51, %56 : vector<4x256xf32>
    %c255_i32 = arith.constant 255 : i32
    %58 = tpu.dynamic_rotate %12 by %c255_i32 dim 1 : vector<4x256xf32>, i32 -> vector<4x256xf32>
    %59 = vector.broadcast %7 : vector<1x256xf32> to vector<4x256xf32>
    %60 = arith.mulf %58, %59 : vector<4x256xf32>
    %c5 = arith.constant 5 : index
    %c0_22 = arith.constant 0 : index
    %c0_23 = arith.constant 0 : index
    %61 = vector.load %arg2[%c5, %c0_22, %c0_23] : memref<9x4x4xf32, #tpu.memory_space<vmem>>, vector<1x4x4xf32>
    %62 = vector.shape_cast %61 : vector<1x4x4xf32> to vector<4x4xf32>
    %63 = arith.truncf %62 : vector<4x4xf32> to vector<4x4xbf16>
    %64 = arith.truncf %60 : vector<4x256xf32> to vector<4x256xbf16>
    %cst_24 = arith.constant dense<0.000000e+00> : vector<4x256xf32>
    %65 = tpu.matmul %63, %64, %cst_24 {dimension_numbers = #tpu.dot_dimension_numbers<[1], [0], [0], [1], [0, 0, 1, 1], [], []>} : vector<4x4xbf16>, vector<4x256xbf16>, vector<4x256xf32> -> vector<4x256xf32>
    %66 = arith.addf %57, %65 : vector<4x256xf32>
    %c241_i32 = arith.constant 241 : i32
    %67 = tpu.dynamic_rotate %12 by %c241_i32 dim 1 : vector<4x256xf32>, i32 -> vector<4x256xf32>
    %68 = vector.broadcast %8 : vector<1x256xf32> to vector<4x256xf32>
    %69 = arith.mulf %67, %68 : vector<4x256xf32>
    %c6 = arith.constant 6 : index
    %c0_25 = arith.constant 0 : index
    %c0_26 = arith.constant 0 : index
    %70 = vector.load %arg2[%c6, %c0_25, %c0_26] : memref<9x4x4xf32, #tpu.memory_space<vmem>>, vector<1x4x4xf32>
    %71 = vector.shape_cast %70 : vector<1x4x4xf32> to vector<4x4xf32>
    %72 = arith.truncf %71 : vector<4x4xf32> to vector<4x4xbf16>
    %73 = arith.truncf %69 : vector<4x256xf32> to vector<4x256xbf16>
    %cst_27 = arith.constant dense<0.000000e+00> : vector<4x256xf32>
    %74 = tpu.matmul %72, %73, %cst_27 {dimension_numbers = #tpu.dot_dimension_numbers<[1], [0], [0], [1], [0, 0, 1, 1], [], []>} : vector<4x4xbf16>, vector<4x256xbf16>, vector<4x256xf32> -> vector<4x256xf32>
    %75 = arith.addf %66, %74 : vector<4x256xf32>
    %c240_i32 = arith.constant 240 : i32
    %76 = tpu.dynamic_rotate %12 by %c240_i32 dim 1 : vector<4x256xf32>, i32 -> vector<4x256xf32>
    %77 = vector.broadcast %9 : vector<1x256xf32> to vector<4x256xf32>
    %78 = arith.mulf %76, %77 : vector<4x256xf32>
    %c7 = arith.constant 7 : index
    %c0_28 = arith.constant 0 : index
    %c0_29 = arith.constant 0 : index
    %79 = vector.load %arg2[%c7, %c0_28, %c0_29] : memref<9x4x4xf32, #tpu.memory_space<vmem>>, vector<1x4x4xf32>
    %80 = vector.shape_cast %79 : vector<1x4x4xf32> to vector<4x4xf32>
    %81 = arith.truncf %80 : vector<4x4xf32> to vector<4x4xbf16>
    %82 = arith.truncf %78 : vector<4x256xf32> to vector<4x256xbf16>
    %cst_30 = arith.constant dense<0.000000e+00> : vector<4x256xf32>
    %83 = tpu.matmul %81, %82, %cst_30 {dimension_numbers = #tpu.dot_dimension_numbers<[1], [0], [0], [1], [0, 0, 1, 1], [], []>} : vector<4x4xbf16>, vector<4x256xbf16>, vector<4x256xf32> -> vector<4x256xf32>
    %84 = arith.addf %75, %83 : vector<4x256xf32>
    %c239_i32 = arith.constant 239 : i32
    %85 = tpu.dynamic_rotate %12 by %c239_i32 dim 1 : vector<4x256xf32>, i32 -> vector<4x256xf32>
    %86 = vector.broadcast %10 : vector<1x256xf32> to vector<4x256xf32>
    %87 = arith.mulf %85, %86 : vector<4x256xf32>
    %c8 = arith.constant 8 : index
    %c0_31 = arith.constant 0 : index
    %c0_32 = arith.constant 0 : index
    %88 = vector.load %arg2[%c8, %c0_31, %c0_32] : memref<9x4x4xf32, #tpu.memory_space<vmem>>, vector<1x4x4xf32>
    %89 = vector.shape_cast %88 : vector<1x4x4xf32> to vector<4x4xf32>
    %90 = arith.truncf %89 : vector<4x4xf32> to vector<4x4xbf16>
    %91 = arith.truncf %87 : vector<4x256xf32> to vector<4x256xbf16>
    %cst_33 = arith.constant dense<0.000000e+00> : vector<4x256xf32>
    %92 = tpu.matmul %90, %91, %cst_33 {dimension_numbers = #tpu.dot_dimension_numbers<[1], [0], [0], [1], [0, 0, 1, 1], [], []>} : vector<4x4xbf16>, vector<4x256xbf16>, vector<4x256xf32> -> vector<4x256xf32>
    %93 = arith.addf %84, %92 : vector<4x256xf32>
    %cst_34 = arith.constant 0.000000e+00 : f32
    %94 = vector.broadcast %cst_34 : f32 to vector<4x256xf32>
    %95 = arith.maximumf %93, %94 : vector<4x256xf32>
    %c0_35 = arith.constant 0 : index
    %c0_36 = arith.constant 0 : index
    %96 = vector.load %arg5[%c0_35, %c0_36] : memref<4x1xf32, #tpu.memory_space<vmem>>, vector<4x1xf32>
    %97 = vector.shape_cast %96 : vector<4x1xf32> to vector<4x1xf32>
    %98 = vector.broadcast %97 : vector<4x1xf32> to vector<4x256xf32>
    %c17_i32_37 = arith.constant 17 : i32
    %99 = tpu.dynamic_rotate %95 by %c17_i32_37 dim 1 : vector<4x256xf32>, i32 -> vector<4x256xf32>
    %100 = vector.broadcast %3 : vector<1x256xf32> to vector<4x256xf32>
    %101 = arith.mulf %99, %100 : vector<4x256xf32>
    %c0_38 = arith.constant 0 : index
    %c0_39 = arith.constant 0 : index
    %c0_40 = arith.constant 0 : index
    %102 = vector.load %arg4[%c0_38, %c0_39, %c0_40] : memref<9x4x4xf32, #tpu.memory_space<vmem>>, vector<1x4x4xf32>
    %103 = vector.shape_cast %102 : vector<1x4x4xf32> to vector<4x4xf32>
    %104 = arith.truncf %103 : vector<4x4xf32> to vector<4x4xbf16>
    %105 = arith.truncf %101 : vector<4x256xf32> to vector<4x256xbf16>
    %cst_41 = arith.constant dense<0.000000e+00> : vector<4x256xf32>
    %106 = tpu.matmul %104, %105, %cst_41 {dimension_numbers = #tpu.dot_dimension_numbers<[1], [0], [0], [1], [0, 0, 1, 1], [], []>} : vector<4x4xbf16>, vector<4x256xbf16>, vector<4x256xf32> -> vector<4x256xf32>
    %107 = arith.addf %98, %106 : vector<4x256xf32>
    %c16_i32_42 = arith.constant 16 : i32
    %108 = tpu.dynamic_rotate %95 by %c16_i32_42 dim 1 : vector<4x256xf32>, i32 -> vector<4x256xf32>
    %109 = vector.broadcast %4 : vector<1x256xf32> to vector<4x256xf32>
    %110 = arith.mulf %108, %109 : vector<4x256xf32>
    %c1_43 = arith.constant 1 : index
    %c0_44 = arith.constant 0 : index
    %c0_45 = arith.constant 0 : index
    %111 = vector.load %arg4[%c1_43, %c0_44, %c0_45] : memref<9x4x4xf32, #tpu.memory_space<vmem>>, vector<1x4x4xf32>
    %112 = vector.shape_cast %111 : vector<1x4x4xf32> to vector<4x4xf32>
    %113 = arith.truncf %112 : vector<4x4xf32> to vector<4x4xbf16>
    %114 = arith.truncf %110 : vector<4x256xf32> to vector<4x256xbf16>
    %cst_46 = arith.constant dense<0.000000e+00> : vector<4x256xf32>
    %115 = tpu.matmul %113, %114, %cst_46 {dimension_numbers = #tpu.dot_dimension_numbers<[1], [0], [0], [1], [0, 0, 1, 1], [], []>} : vector<4x4xbf16>, vector<4x256xbf16>, vector<4x256xf32> -> vector<4x256xf32>
    %116 = arith.addf %107, %115 : vector<4x256xf32>
    %c15_i32_47 = arith.constant 15 : i32
    %117 = tpu.dynamic_rotate %95 by %c15_i32_47 dim 1 : vector<4x256xf32>, i32 -> vector<4x256xf32>
    %118 = vector.broadcast %5 : vector<1x256xf32> to vector<4x256xf32>
    %119 = arith.mulf %117, %118 : vector<4x256xf32>
    %c2_48 = arith.constant 2 : index
    %c0_49 = arith.constant 0 : index
    %c0_50 = arith.constant 0 : index
    %120 = vector.load %arg4[%c2_48, %c0_49, %c0_50] : memref<9x4x4xf32, #tpu.memory_space<vmem>>, vector<1x4x4xf32>
    %121 = vector.shape_cast %120 : vector<1x4x4xf32> to vector<4x4xf32>
    %122 = arith.truncf %121 : vector<4x4xf32> to vector<4x4xbf16>
    %123 = arith.truncf %119 : vector<4x256xf32> to vector<4x256xbf16>
    %cst_51 = arith.constant dense<0.000000e+00> : vector<4x256xf32>
    %124 = tpu.matmul %122, %123, %cst_51 {dimension_numbers = #tpu.dot_dimension_numbers<[1], [0], [0], [1], [0, 0, 1, 1], [], []>} : vector<4x4xbf16>, vector<4x256xbf16>, vector<4x256xf32> -> vector<4x256xf32>
    %125 = arith.addf %116, %124 : vector<4x256xf32>
    %c1_i32_52 = arith.constant 1 : i32
    %126 = tpu.dynamic_rotate %95 by %c1_i32_52 dim 1 : vector<4x256xf32>, i32 -> vector<4x256xf32>
    %127 = vector.broadcast %6 : vector<1x256xf32> to vector<4x256xf32>
    %128 = arith.mulf %126, %127 : vector<4x256xf32>
    %c3_53 = arith.constant 3 : index
    %c0_54 = arith.constant 0 : index
    %c0_55 = arith.constant 0 : index
    %129 = vector.load %arg4[%c3_53, %c0_54, %c0_55] : memref<9x4x4xf32, #tpu.memory_space<vmem>>, vector<1x4x4xf32>
    %130 = vector.shape_cast %129 : vector<1x4x4xf32> to vector<4x4xf32>
    %131 = arith.truncf %130 : vector<4x4xf32> to vector<4x4xbf16>
    %132 = arith.truncf %128 : vector<4x256xf32> to vector<4x256xbf16>
    %cst_56 = arith.constant dense<0.000000e+00> : vector<4x256xf32>
    %133 = tpu.matmul %131, %132, %cst_56 {dimension_numbers = #tpu.dot_dimension_numbers<[1], [0], [0], [1], [0, 0, 1, 1], [], []>} : vector<4x4xbf16>, vector<4x256xbf16>, vector<4x256xf32> -> vector<4x256xf32>
    %134 = arith.addf %125, %133 : vector<4x256xf32>
    %c4_57 = arith.constant 4 : index
    %c0_58 = arith.constant 0 : index
    %c0_59 = arith.constant 0 : index
    %135 = vector.load %arg4[%c4_57, %c0_58, %c0_59] : memref<9x4x4xf32, #tpu.memory_space<vmem>>, vector<1x4x4xf32>
    %136 = vector.shape_cast %135 : vector<1x4x4xf32> to vector<4x4xf32>
    %137 = arith.truncf %136 : vector<4x4xf32> to vector<4x4xbf16>
    %138 = arith.truncf %95 : vector<4x256xf32> to vector<4x256xbf16>
    %cst_60 = arith.constant dense<0.000000e+00> : vector<4x256xf32>
    %139 = tpu.matmul %137, %138, %cst_60 {dimension_numbers = #tpu.dot_dimension_numbers<[1], [0], [0], [1], [0, 0, 1, 1], [], []>} : vector<4x4xbf16>, vector<4x256xbf16>, vector<4x256xf32> -> vector<4x256xf32>
    %140 = arith.addf %134, %139 : vector<4x256xf32>
    %c255_i32_61 = arith.constant 255 : i32
    %141 = tpu.dynamic_rotate %95 by %c255_i32_61 dim 1 : vector<4x256xf32>, i32 -> vector<4x256xf32>
    %142 = vector.broadcast %7 : vector<1x256xf32> to vector<4x256xf32>
    %143 = arith.mulf %141, %142 : vector<4x256xf32>
    %c5_62 = arith.constant 5 : index
    %c0_63 = arith.constant 0 : index
    %c0_64 = arith.constant 0 : index
    %144 = vector.load %arg4[%c5_62, %c0_63, %c0_64] : memref<9x4x4xf32, #tpu.memory_space<vmem>>, vector<1x4x4xf32>
    %145 = vector.shape_cast %144 : vector<1x4x4xf32> to vector<4x4xf32>
    %146 = arith.truncf %145 : vector<4x4xf32> to vector<4x4xbf16>
    %147 = arith.truncf %143 : vector<4x256xf32> to vector<4x256xbf16>
    %cst_65 = arith.constant dense<0.000000e+00> : vector<4x256xf32>
    %148 = tpu.matmul %146, %147, %cst_65 {dimension_numbers = #tpu.dot_dimension_numbers<[1], [0], [0], [1], [0, 0, 1, 1], [], []>} : vector<4x4xbf16>, vector<4x256xbf16>, vector<4x256xf32> -> vector<4x256xf32>
    %149 = arith.addf %140, %148 : vector<4x256xf32>
    %c241_i32_66 = arith.constant 241 : i32
    %150 = tpu.dynamic_rotate %95 by %c241_i32_66 dim 1 : vector<4x256xf32>, i32 -> vector<4x256xf32>
    %151 = vector.broadcast %8 : vector<1x256xf32> to vector<4x256xf32>
    %152 = arith.mulf %150, %151 : vector<4x256xf32>
    %c6_67 = arith.constant 6 : index
    %c0_68 = arith.constant 0 : index
    %c0_69 = arith.constant 0 : index
    %153 = vector.load %arg4[%c6_67, %c0_68, %c0_69] : memref<9x4x4xf32, #tpu.memory_space<vmem>>, vector<1x4x4xf32>
    %154 = vector.shape_cast %153 : vector<1x4x4xf32> to vector<4x4xf32>
    %155 = arith.truncf %154 : vector<4x4xf32> to vector<4x4xbf16>
    %156 = arith.truncf %152 : vector<4x256xf32> to vector<4x256xbf16>
    %cst_70 = arith.constant dense<0.000000e+00> : vector<4x256xf32>
    %157 = tpu.matmul %155, %156, %cst_70 {dimension_numbers = #tpu.dot_dimension_numbers<[1], [0], [0], [1], [0, 0, 1, 1], [], []>} : vector<4x4xbf16>, vector<4x256xbf16>, vector<4x256xf32> -> vector<4x256xf32>
    %158 = arith.addf %149, %157 : vector<4x256xf32>
    %c240_i32_71 = arith.constant 240 : i32
    %159 = tpu.dynamic_rotate %95 by %c240_i32_71 dim 1 : vector<4x256xf32>, i32 -> vector<4x256xf32>
    %160 = vector.broadcast %9 : vector<1x256xf32> to vector<4x256xf32>
    %161 = arith.mulf %159, %160 : vector<4x256xf32>
    %c7_72 = arith.constant 7 : index
    %c0_73 = arith.constant 0 : index
    %c0_74 = arith.constant 0 : index
    %162 = vector.load %arg4[%c7_72, %c0_73, %c0_74] : memref<9x4x4xf32, #tpu.memory_space<vmem>>, vector<1x4x4xf32>
    %163 = vector.shape_cast %162 : vector<1x4x4xf32> to vector<4x4xf32>
    %164 = arith.truncf %163 : vector<4x4xf32> to vector<4x4xbf16>
    %165 = arith.truncf %161 : vector<4x256xf32> to vector<4x256xbf16>
    %cst_75 = arith.constant dense<0.000000e+00> : vector<4x256xf32>
    %166 = tpu.matmul %164, %165, %cst_75 {dimension_numbers = #tpu.dot_dimension_numbers<[1], [0], [0], [1], [0, 0, 1, 1], [], []>} : vector<4x4xbf16>, vector<4x256xbf16>, vector<4x256xf32> -> vector<4x256xf32>
    %167 = arith.addf %158, %166 : vector<4x256xf32>
    %c239_i32_76 = arith.constant 239 : i32
    %168 = tpu.dynamic_rotate %95 by %c239_i32_76 dim 1 : vector<4x256xf32>, i32 -> vector<4x256xf32>
    %169 = vector.broadcast %10 : vector<1x256xf32> to vector<4x256xf32>
    %170 = arith.mulf %168, %169 : vector<4x256xf32>
    %c8_77 = arith.constant 8 : index
    %c0_78 = arith.constant 0 : index
    %c0_79 = arith.constant 0 : index
    %171 = vector.load %arg4[%c8_77, %c0_78, %c0_79] : memref<9x4x4xf32, #tpu.memory_space<vmem>>, vector<1x4x4xf32>
    %172 = vector.shape_cast %171 : vector<1x4x4xf32> to vector<4x4xf32>
    %173 = arith.truncf %172 : vector<4x4xf32> to vector<4x4xbf16>
    %174 = arith.truncf %170 : vector<4x256xf32> to vector<4x256xbf16>
    %cst_80 = arith.constant dense<0.000000e+00> : vector<4x256xf32>
    %175 = tpu.matmul %173, %174, %cst_80 {dimension_numbers = #tpu.dot_dimension_numbers<[1], [0], [0], [1], [0, 0, 1, 1], [], []>} : vector<4x4xbf16>, vector<4x256xbf16>, vector<4x256xf32> -> vector<4x256xf32>
    %176 = arith.addf %167, %175 : vector<4x256xf32>
    %177 = arith.addf %176, %1 : vector<4x256xf32>
    %c0_81 = arith.constant 0 : index
    %c0_82 = arith.constant 0 : index
    %c0_83 = arith.constant 0 : index
    %178 = vector.load %arg7[%c0_81, %c0_82, %c0_83] : memref<1x4x256xf32, #tpu.memory_space<vmem>>, vector<1x4x256xf32>
    %179 = vector.shape_cast %178 : vector<1x4x256xf32> to vector<4x256xf32>
    %180 = vector.shape_cast %177 : vector<4x256xf32> to vector<1x4x256xf32>
    tpu.vector_store %arg7[%c0_81, %c0_82, %c0_83], %180 {strides = array<i32>} : memref<1x4x256xf32, #tpu.memory_space<vmem>>, vector<1x4x256xf32>,
    return
  }
  func.func @transform_0(%arg0: i32) -> (i32, i32, i32) {
    %c0_i32 = arith.constant 0 : i32
    %c0_i32_0 = arith.constant 0 : i32
    %c0_i32_1 = arith.constant 0 : i32
    return %arg0, %c0_i32, %c0_i32_0 : i32, i32, i32
  }
  func.func @transform_1(%arg0: i32) -> (i32, i32, i32) {
    %c0_i32 = arith.constant 0 : i32
    %c0_i32_0 = arith.constant 0 : i32
    %c0_i32_1 = arith.constant 0 : i32
    %c0_i32_2 = arith.constant 0 : i32
    return %c0_i32, %c0_i32_0, %c0_i32_1 : i32, i32, i32
  }
  func.func @transform_2(%arg0: i32) -> (i32, i32) {
    %c0_i32 = arith.constant 0 : i32
    %c0_i32_0 = arith.constant 0 : i32
    %c0_i32_1 = arith.constant 0 : i32
    return %c0_i32, %c0_i32_0 : i32, i32
  }
  func.func @transform_3(%arg0: i32) -> (i32, i32, i32) {
    %c0_i32 = arith.constant 0 : i32
    %c0_i32_0 = arith.constant 0 : i32
    %c0_i32_1 = arith.constant 0 : i32
    %c0_i32_2 = arith.constant 0 : i32
    return %c0_i32, %c0_i32_0, %c0_i32_1 : i32, i32, i32
  }
  func.func @transform_4(%arg0: i32) -> (i32, i32) {
    %c0_i32 = arith.constant 0 : i32
    %c0_i32_0 = arith.constant 0 : i32
    %c0_i32_1 = arith.constant 0 : i32
    return %c0_i32, %c0_i32_0 : i32, i32
  }
  func.func @transform_5(%arg0: i32) -> (i32, i32) {
    %c0_i32 = arith.constant 0 : i32
    %c0_i32_0 = arith.constant 0 : i32
    %c0_i32_1 = arith.constant 0 : i32
    return %c0_i32, %c0_i32_0 : i32, i32
  }
  func.func @transform_6(%arg0: i32) -> (i32, i32, i32) {
    %c0_i32 = arith.constant 0 : i32
    %c0_i32_0 = arith.constant 0 : i32
    %c0_i32_1 = arith.constant 0 : i32
    return %arg0, %c0_i32, %c0_i32_0 : i32, i32, i32
  }
}

</mosaic_0001>

<bundles_post_ra>
// kernel: tpu_custom_call.1
= control target key start
LH: loop header
LB: loop body
LE: loop exit
PB: predicated region body
PF: predicated region fallthrough
CT: control target
= control target key end

     0   :  { %11 = vsyncpa [#allocation3], 0  ;;  %s2345_s0 = inlined_call_operand.vmem [shape: f32[2,4,256], index: 0, kind: input, shape index: {}]   ;;  %s2346_s1 = inlined_call_operand.vmem [shape: f32[9,4,4], index: 1, kind: input, shape index: {}]   ;;  %s2347_s2 = inlined_call_operand.vmem [shape: f32[4,1], index: 2, kind: input, shape index: {}]   ;;  %s2348_s3 = inlined_call_operand.vmem [shape: f32[9,4,4], index: 3, kind: input, shape index: {}]   ;;  %s2349_s4 = inlined_call_operand.vmem [shape: f32[4,1], index: 4, kind: input, shape index: {}]   ;;  %s2350_s5 = inlined_call_operand.vmem [shape: f32[9,256], index: 5, kind: input, shape index: {}]   ;;  %s2351_s6 = inlined_call_operand.hbm [shape: f32[2,4,256], index: 6, kind: output, shape index: {}]  }
   0x1   :  { %13 = vsyncpa [#allocation3 + $0x1], 0  ;;  %s1847_s21 = smov 0   ;;  %s1849_s22 = smov 0  }
   0x2   :  { %s1851_s23 = smov 0   ;;  %s1853_s24 = smov 0  }
   0x3 LB: > { %s1868_s25 = sadd.s32 4294967295, %s1800_s24   ;;  %s1586_s26 = sadd.s32 4294967294, %s1800_s24   ;;  %s1800_s24 = sphi %s1853_s24, %s2357_s24   ;;  %s1796_s23 = sphi %s1851_s23, %s2356_s23   ;;  %s1792_s22 = sphi %s1849_s22, %s2355_s22   ;;  %s1788_s21 = sphi %s1847_s21, %s2354_s21  }
   0x4   : > { %s1872_s27 = sadd.s32 1, %s1800_s24   ;;  %s157_s28 = sadd.s32 1, %s1796_s23 }
   0x5   : > { %s154_s29 = ssub.s32 %s1800_s24, %s1872_s27  ;;  %p167_p0 = scmp.ne.s32.totalorder %s1796_s23, %s1792_s22 }
   0x6   : > { %p155_p1 = scmp.eq.s32.totalorder %s154_s29, 0  ;;  %p168_p2 = scmp.eq.s32.totalorder %s1868_s25, 1 }
   0x7   : > { %p173_p3 = scmp.ne.s32.totalorder %s1792_s22, %s1788_s21  ;;  %p174_p4 = scmp.eq.s32.totalorder %s1586_s26, 1 }
   0x8   : > { %s1883_s30 = scalar_select %p155_p1, %s1796_s23, %s157_s28  }
   0x9   : > { %p1885_p5 = por %p168_p2, %p167_p0  ;;  %p1889_p6 = por %p174_p4, %p173_p3 }
   0xa   : > { %p1589_p7 = scmp.ge.s32.totalorder %s1800_s24, 1  ;;  %p215_p8 = scmp.lt.s32.totalorder %s1800_s24, 3 }
   0xc   : > { %p216_p9 = pnand %p1589_p7, %p215_p8 }
   0xd   : > { %p245_p10 = scmp.lt.s32.totalorder (!%p216_p9), %s1868_s25, 1  ;;  %v1802_v2 = vmov (!%p216_p9), 0   ;;  %s1803_s14 = smov (!%p216_p9), 16   ;;  %v257_v4 = vld [vmem:[%s2347_s2] sm:$0xf] (!%p216_p9)  ;;  %v270_v5 = vlaneseq (!%p216_p9)  ;;  %v1961_v11 = vld [vmem:[%s2350_s5 + $0x8] sm:$0xff] (!%p216_p9) }
   0xe   : > { %219 = sbr.rel (%p216_p9) target bundleno = 893 (0x37d), region = 44  ;;  %332 = vmatprep.mubr.bf16.mxu0 (!%p216_p9), %v1802_v2  ;;  %1736 = vset.pattern.permute.xlu0 (!%p216_p9), %v1802_v2  ;;  %s1804_s15 = smov (!%p216_p9), 17   ;;  %v1956_v10 = vld [vmem:[%s2350_s5] sm:$0xff] (!%p216_p9)  ;;  %vm293_vm3 = vcmask (!%p216_p9), 1041408   ;;  %vm289_vm4 = vcmask (!%p216_p9), 31744  }
   0xf   : > { %979 = vmatprep.mubr.bf16.mxu1 (!%p216_p9), %v1802_v2  ;;  %s1805_s16 = smov (!%p216_p9), 15   ;;  %s1806_s17 = smov (!%p216_p9), 1   ;;  %v1947_v6 = vshrl.u32 (!%p216_p9), %v270_v5, 7  ;;  %v1949_v7 = vand.u32 (!%p216_p9), 127, %v270_v5  ;;  %v285_v30 = vld [vmem:[%s2346_s1] sm:$0xf] (!%p216_p9) }
  0x10   : > { %s1807_s18 = smov (!%p216_p9), 127   ;;  %s1808_s19 = smov (!%p216_p9), 113   ;;  %v286_v39 = vpack.c.bf16 (!%p216_p9), %v285_v30, %v285_v30  ;;  %v1595_v51 = vld [vmem:[%s2346_s1 + $0x4] sm:$0xf] (!%p216_p9)  ;;  %v1598_v60 = vld [vmem:[%s2346_s1 + $0x8] sm:$0xf] (!%p216_p9) }
  0x11   : > { %s1809_s20 = smov (!%p216_p9), 112   ;;  %s1810_s26 = smov (!%p216_p9), 111   ;;  %v352_v8 = vsub.s32 (!%p216_p9), 1, %v1947_v6  ;;  %v277_v9 = vsub.s32 (!%p216_p9), 0, %v1947_v6  ;;  %v426_v14 = vsub.s32 (!%p216_p9), 2, %v1947_v6  ;;  %vm347_vm0 = vcmp.lt.s32.totalorder (!%p216_p9), %v1949_v7, 16 }
  0x12   : > { %vm272_vm1 = vcmp.lt.s32.totalorder (!%p216_p9), %v1949_v7, 17  ;;  %vm421_vm2 = vcmp.lt.s32.totalorder (!%p216_p9), %v1949_v7, 15  ;;  %v500_v44 = vsub.s32 (!%p216_p9), 3, %v1947_v6  ;;  %vm495_vm5 = vcmp.lt.s32.totalorder (!%p216_p9), %v1949_v7, 1 }
  0x13   : > { %v1967_v15 = vrot.slane (!%p216_p9), %v1956_v10, %v352_v8  ;;  %v1970_v16 = vrot.slane (!%p216_p9), %v1961_v11, %v352_v8  ;;  %v1973_v17 = vrot.slane (!%p216_p9), %v1956_v10, %v277_v9  ;;  %v1976_v18 = vrot.slane (!%p216_p9), %v1961_v11, %v277_v9 }
  0x14   : > { %v1980_v21 = vrot.slane (!%p216_p9), %v1961_v11, %v426_v14  ;;  %v2005_v42 = vrot.slane (!%p216_p9), %v1956_v10, %v426_v14  ;;  %v2016_v49 = vrot.slane (!%p216_p9), %v1961_v11, %v500_v44  ;;  %v362_v54 = vpack.c.bf16 (!%p216_p9), %v1595_v51, %v1595_v51 }
  0x15   : > { %s246_s9 = scalar_select %p245_p10, %s1868_s25, 1  ;;  %v2026_v56 = vrot.slane %v1956_v10, %v500_v44  ;;  %v436_v62 = vpack.c.bf16 %v1598_v60, %v1598_v60  ;;  %v631_v5 = vsub.s32 5, %v1947_v6  ;;  %vm626_vm6 = vcmp.lt.s32.totalorder %v1949_v7, 127 }
  0x16   : > { %vm700_vm7 = vcmp.lt.s32.totalorder %v1949_v7, 113  ;;  %vm774_vm8 = vcmp.lt.s32.totalorder %v1949_v7, 112  ;;  %vm848_vm9 = vcmp.lt.s32.totalorder %v1949_v7, 111 }
  0x17   : > { %s1652_s10 = sshll.u32 %s246_s9, 3 }
  0x18   : > { %s249_s13 = scalar_lea.vmem %s2345_s0, %s1652_s10 }
  0x19   : > { %v1900_v0 = vld [vmem:[%s249_s13] sm:$0xff] }
  0x1a   : > { %v1903_v1 = vmax.f32 %v1900_v0, 0.0 }
  0x1c   : > { %343 = vrot.lane.b32.xlu1 %v1903_v1, %s1803_s14  ;;  %266 = vrot.lane.b32.xlu0 %v1903_v1, %s1804_s15  ;;  %v1913_v3 = vcombine.high %v1903_v1, %v1903_v1  ;;  %v568_v14 = vpack.c.bf16 %v1903_v1, %v1903_v1 }
  0x20   : > { %345 = vrot.lane.b32.xlu1 %v1913_v3, %s1803_s14  ;;  %268 = vrot.lane.b32.xlu0 %v1913_v3, %s1804_s15 }
  0x24   : > { %419 = vrot.lane.b32.xlu1 %v1913_v3, %s1805_s16  ;;  %417 = vrot.lane.b32.xlu0 %v1903_v1, %s1805_s16 }
  0x28   : > { %493 = vrot.lane.b32.xlu1 %v1913_v3, %s1806_s17  ;;  %491 = vrot.lane.b32.xlu0 %v1903_v1, %s1806_s17 }
  0x2c   : > { %624 = vrot.lane.b32.xlu1 %v1913_v3, %s1807_s18  ;;  %622 = vrot.lane.b32.xlu0 %v1903_v1, %s1807_s18 }
  0x30   : > { %698 = vrot.lane.b32.xlu1 %v1913_v3, %s1808_s19  ;;  %696 = vrot.lane.b32.xlu0 %v1903_v1, %s1808_s19 }
  0x34   : > { %772 = vrot.lane.b32.xlu1 %v1913_v3, %s1809_s20  ;;  %770 = vrot.lane.b32.xlu0 %v1903_v1, %s1809_s20 }
  0x38   : > { %846 = vrot.lane.b32.xlu1 %v1913_v3, %s1810_s26  ;;  %844 = vrot.lane.b32.xlu0 %v1903_v1, %s1810_s26 }
  0x3c   : > { %260 = vperm.xlu0 %1736, %v257_v4   ;;  %v569_v4 = vpack.c.bf16 %v1913_v3, %v1913_v3  ;;  %v1601_v3 = vld [vmem:[%s2346_s1 + $0xc] sm:$0xf] }
  0x8e   : > { %v344_v12 = vpop.permute.xlu1 %343  ;;  %v267_v13 = vpop.permute.xlu0 %266 }
  0x92   : > { %v346_v19 = vpop.permute.xlu1 %345  ;;  %v269_v20 = vpop.permute.xlu0 %268 }
  0x93   : > { %v348_v22 = vsel %vm347_vm0, %v344_v12, %v346_v19  ;;  %v349_v23 = vsel %vm347_vm0, %v346_v19, %v344_v12  ;;  %v273_v24 = vsel %vm272_vm1, %v267_v13, %v269_v20  ;;  %v274_v25 = vsel %vm272_vm1, %v269_v20, %v267_v13 }
  0x94   : > { %v358_v26 = vmul.f32 %v1967_v15, %v349_v23  ;;  %v359_v27 = vmul.f32 %v1970_v16, %v348_v22  ;;  %v283_v28 = vmul.f32 %v1973_v17, %v274_v25  ;;  %v284_v29 = vmul.f32 %v1976_v18, %v273_v24 }
  0x95   : > { %v2046_v12 = vrot.slane %v1961_v11, %v631_v5  ;;  %v510_v20 = vpack.c.bf16 %v1601_v3, %v1601_v3  ;;  %v574_v22 = vsel %vm293_vm3, %v568_v14, 0  ;;  %v2058_v23 = vrot.slane %v1956_v10, %v631_v5 }
  0x96   : > { %v363_v31 = vpack.c.bf16 %v358_v26, %v358_v26  ;;  %v364_v32 = vpack.c.bf16 %v359_v27, %v359_v27  ;;  %v288_v33 = vpack.c.bf16 %v284_v29, %v284_v29  ;;  %v287_v34 = vpack.c.bf16 %v283_v28, %v283_v28  ;;  %v420_v35 = vpop.permute.xlu1 %419  ;;  %v418_v36 = vpop.permute.xlu0 %417 }
  0x97   : > { %v422_v37 = vsel %vm421_vm2, %v418_v36, %v420_v35  ;;  %v423_v45 = vsel %vm421_vm2, %v420_v35, %v418_v36  ;;  %v705_v25 = vsub.s32 6, %v1947_v6 }
  0x98   : > { %1593 = vmatprep.subr.msk.bf16.mxu0 %vm293_vm3, %v288_v33  ;;  %v295_v38 = vsel %vm293_vm3, %v287_v34, 0  ;;  %v433_v40 = vmul.f32 %v1980_v21, %v422_v37  ;;  %v369_v41 = vsel %vm293_vm3, %v363_v31, 0  ;;  %v432_v48 = vmul.f32 %v2005_v42, %v423_v45  ;;  %v1604_v31 = vld [vmem:[%s2346_s1 + $0x10] sm:$0xf]  ;;  %v1607_v45 = vld [vmem:[%s2346_s1 + $0x14] sm:$0xf] }
  0x99   : > { %301 = vmatpush1.bf16.msra.mxu0 %v295_v38  ;;  %v2069_v29 = vrot.slane %v1961_v11, %v705_v25  ;;  %v567_v34 = vpack.c.bf16 %v1604_v31, %v1604_v31  ;;  %v2079_v36 = vrot.slane %v1956_v10, %v705_v25  ;;  %v779_v38 = vsub.s32 7, %v1947_v6 }
  0x9a   : > { %1596 = vmatprep.subr.msk.bf16.mxu0 %vm293_vm3, %v364_v32  ;;  %v438_v43 = vpack.c.bf16 %v433_v40, %v433_v40  ;;  %v494_v46 = vpop.permute.xlu1 %493  ;;  %v492_v47 = vpop.permute.xlu0 %491  ;;  %v437_v52 = vpack.c.bf16 %v432_v48, %v432_v48  ;;  %v641_v48 = vpack.c.bf16 %v1607_v45, %v1607_v45 }
  0x9b   : > { %v496_v50 = vsel %vm495_vm5, %v492_v47, %v494_v46  ;;  %v497_v58 = vsel %vm495_vm5, %v494_v46, %v492_v47  ;;  %v2090_v44 = vrot.slane %v1961_v11, %v779_v38  ;;  %v2100_v51 = vrot.slane %v1956_v10, %v779_v38  ;;  %v2112_v10 = vld [vmem:[%s2350_s5 + $0x18] ss:$0 sm:$0xff] }
  0x9c   : > { %1594 = vmatmul.mubr.msk.bf16.vlgmr.msra.gmra.mrb[0].mxu0 %vm289_vm4, %v286_v39  ;;  %v507_v53 = vmul.f32 %v2016_v49, %v496_v50  ;;  %v443_v55 = vsel %vm293_vm3, %v437_v52, 0  ;;  %v506_v59 = vmul.f32 %v2026_v56, %v497_v58  ;;  %v1610_v58 = vld [vmem:[%s2346_s1 + $0x18] sm:$0xf] }
  0x9d   : > { %375 = vmatpush1.bf16.msra.mxu0 %v369_v41  ;;  %406 = vmatprep.mubr.bf16.mxu0 %v1802_v2 }
  0x9e   : > { %1599 = vmatprep.subr.msk.bf16.mxu0 %vm293_vm3, %v438_v43  ;;  %v512_v57 = vpack.c.bf16 %v507_v53, %v507_v53  ;;  %v511_v61 = vpack.c.bf16 %v506_v59, %v506_v59  ;;  %v625_v8 = vpop.permute.xlu1 %624  ;;  %v623_v9 = vpop.permute.xlu0 %622 }
  0x9f   : > { %v628_v13 = vsel %vm626_vm6, %v625_v8, %v623_v9  ;;  %v627_v26 = vsel %vm626_vm6, %v623_v9, %v625_v8  ;;  %v1613_v9 = vld [vmem:[%s2346_s1 + $0x1c] sm:$0xf] }
  0xa0   : > { %v517_v63 = vsel %vm293_vm3, %v511_v61, 0  ;;  %v638_v19 = vmul.f32 %v2046_v12, %v628_v13  ;;  %v637_v28 = vmul.f32 %v2058_v23, %v627_v26  ;;  %v715_v61 = vpack.c.bf16 %v1610_v58, %v1610_v58 }
  0xa1   : > { %v789_v3 = vpack.c.bf16 %v1613_v9, %v1613_v9 }
  0xa2   : > { %v643_v24 = vpack.c.bf16 %v638_v19, %v638_v19  ;;  %v699_v27 = vpop.permute.xlu1 %698  ;;  %v697_v1 = vpop.permute.xlu0 %696  ;;  %v642_v32 = vpack.c.bf16 %v637_v28, %v637_v28  ;;  %v1618_v19 = vld [vmem:[%s2346_s1 + $0x20] sm:$0xf] }
  0xa3   : > { %v702_v30 = vsel %vm700_vm7, %v699_v27, %v697_v1  ;;  %v701_v39 = vsel %vm700_vm7, %v697_v1, %v699_v27 }
  0xa4   : > { %v712_v33 = vmul.f32 %v2069_v29, %v702_v30  ;;  %v648_v35 = vsel %vm293_vm3, %v642_v32, 0  ;;  %v711_v43 = vmul.f32 %v2079_v36, %v701_v39  ;;  %v920_v32 = vld [vmem:[%s2349_s4] sm:$0xf] }
  0xa6   : > { %v717_v37 = vpack.c.bf16 %v712_v33, %v712_v33  ;;  %v773_v40 = vpop.permute.xlu1 %772  ;;  %v771_v41 = vpop.permute.xlu0 %770  ;;  %v716_v46 = vpack.c.bf16 %v711_v43, %v711_v43 }
  0xa7   : > { %v776_v6 = vsel %vm774_vm8, %v773_v40, %v771_v41  ;;  %v775_v11 = vsel %vm774_vm8, %v771_v41, %v773_v40  ;;  %v934_v41 = vld [vmem:[%s2348_s3] sm:$0xf] }
  0xa8   : > { %1597 = vmatmul.mubr.msk.bf16.vlgmr.msra.gmra.mrb[0].mxu0 %vm289_vm4, %v362_v54  ;;  %v786_v47 = vmul.f32 %v2090_v44, %v776_v6  ;;  %v722_v50 = vsel %vm293_vm3, %v716_v46, 0 }
  0xa9   : > { %449 = vmatpush1.bf16.msra.mxu0 %v443_v55  ;;  %480 = vmatprep.mubr.bf16.mxu0 %v1802_v2  ;;  %v785_v55 = vmul.f32 %v2100_v51, %v775_v11 }
  0xaa   : > { %1602 = vmatprep.subr.msk.bf16.mxu0 %vm293_vm3, %v512_v57  ;;  %v791_v52 = vpack.c.bf16 %v786_v47, %v786_v47  ;;  %v847_v53 = vpop.permute.xlu1 %846  ;;  %v845_v54 = vpop.permute.xlu0 %844 }
  0xab   : > { %v850_v57 = vsel %vm848_vm9, %v847_v53, %v845_v54  ;;  %v790_v59 = vpack.c.bf16 %v785_v55, %v785_v55  ;;  %v849_v5 = vsel %vm848_vm9, %v845_v54, %v847_v53 }
  0xac   : > { %v860_v60 = vmul.f32 %v2112_v10, %v850_v57 }
  0xb4   : > { %1600 = vmatmul.mubr.msk.bf16.vlgmr.msra.gmra.mrb[0].mxu0 %vm289_vm4, %v436_v62  ;;  %v796_v62 = vsel %vm293_vm3, %v790_v59, 0  ;;  %v1623_v59 = vld [vmem:[%s2348_s3 + $0x4] sm:$0xf] }
  0xb5   : > { %523 = vmatpush1.bf16.msra.mxu0 %v517_v63  ;;  %554 = vmatprep.mubr.bf16.mxu0 %v1802_v2  ;;  %v865_v63 = vpack.c.bf16 %v860_v60, %v860_v60 }
  0xb6   : > { %1605 = vmatprep.subr.msk.bf16.mxu0 %vm293_vm3, %v569_v4  ;;  %v2124_v4 = vld [vmem:[%s2350_s5 + $0x10] ss:$0 sm:$0xff] }
  0xb7   : > { %v859_v8 = vmul.f32 %v2124_v4, %v849_v5  ;;  %v1000_v5 = vpack.c.bf16 %v1623_v59, %v1623_v59 }
  0xb9   : > { %v864_v13 = vpack.c.bf16 %v859_v8, %v859_v8 }
  0xbb   : > { %v870_v14 = vsel %vm293_vm3, %v864_v13, 0 }
  0xc0   : > { %1603 = vmatmul.mubr.msk.bf16.vlgmr.msra.gmra.mrb[0].mxu0 %vm289_vm4, %v510_v20  ;;  %v863_v20 = vpack.c.bf16 %v1618_v19, %v1618_v19 }
  0xc1   : > { %580 = vmatpush1.bf16.msra.mxu0 %v574_v22  ;;  %611 = vmatprep.mubr.bf16.mxu0 %v1802_v2  ;;  %v261_v22 = vpop.permute.xlu0 %260 }
  0xc2   : > { %1608 = vmatprep.subr.msk.bf16.mxu0 %vm293_vm3, %v643_v24 }
  0xcc   : > { %1606 = vmatmul.mubr.msk.bf16.vlgmr.msra.gmra.mrb[0].mxu0 %vm289_vm4, %v567_v34 }
  0xcd   : > { %654 = vmatpush1.bf16.msra.mxu0 %v648_v35  ;;  %685 = vmatprep.mubr.bf16.mxu0 %v1802_v2 }
  0xce   : > { %1611 = vmatprep.subr.msk.bf16.mxu0 %vm293_vm3, %v717_v37 }
  0xd8   : > { %1609 = vmatmul.mubr.msk.bf16.vlgmr.msra.gmra.mrb[0].mxu0 %vm289_vm4, %v641_v48 }
  0xd9   : > { %728 = vmatpush1.bf16.msra.mxu0 %v722_v50  ;;  %759 = vmatprep.mubr.bf16.mxu0 %v1802_v2 }
  0xda   : > { %1614 = vmatprep.subr.msk.bf16.mxu0 %vm293_vm3, %v791_v52  ;;  %v935_v52 = vpack.c.bf16 %v934_v41, %v934_v41 }
  0xe4   : > { %1612 = vmatmul.mubr.msk.bf16.vlgmr.msra.gmra.mrb[0].mxu0 %vm289_vm4, %v715_v61 }
  0xe5   : > { %802 = vmatpush1.bf16.msra.mxu0 %v796_v62  ;;  %833 = vmatprep.mubr.bf16.mxu0 %v1802_v2 }
  0xe6   : > { %1619 = vmatprep.subr.msk.bf16.mxu0 %vm293_vm3, %v865_v63 }
  0xf0   : > { %1615 = vmatmul.mubr.msk.bf16.vlgmr.msra.gmra.mrb[0].mxu0 %vm289_vm4, %v789_v3 }
  0xf1   : > { %876 = vmatpush1.bf16.msra.mxu0 %v870_v14  ;;  %907 = vmatprep.mubr.bf16.mxu0 %v1802_v2 }
  0xfc   : > { %1620 = vmatmul.mubr.msk.bf16.vlgmr.msra.gmra.mrb[0].mxu0 %vm289_vm4, %v863_v20 }
 0x1cf   : > { %v909_v24 = vpop.f32.mrb[0].mxu0 }
 0x1d0   : > { %v1654_v25 = vadd.f32 %v909_v24, %v261_v22  ;;  %v911_v26 = vpop.f32.mrb[1].mxu0 }
 0x1d1   : > { %v913_v27 = vpop.f32.mrb[2].mxu0  ;;  %v1655_v28 = vadd.f32 %v911_v26, %v261_v22  ;;  %v1629_v26 = vld [vmem:[%s2348_s3 + $0xc] sm:$0xf] }
 0x1d2   : > { %v2142_v1 = vmax.f32 %v1654_v25, 0.0  ;;  %v914_v30 = vpop.f32.mrb[3].mxu0 }
 0x1d3   : > { %v2148_v31 = vmax.f32 %v1655_v28, 0.0  ;;  %v1130_v28 = vpack.c.bf16 %v1629_v26, %v1629_v26 }
 0x1d4   : > { %990 = vrot.lane.b32.xlu0 %v2142_v1, %s1803_s14  ;;  %926 = vrot.lane.b32.xlu1 %v2142_v1, %s1804_s15  ;;  %v1188_v30 = vpack.c.bf16 %v2142_v1, %v2142_v1 }
 0x1d5   : > { %v1189_v24 = vpack.c.bf16 %v2148_v31, %v2148_v31 }
 0x1d8   : > { %1055 = vrot.lane.b32.xlu0 %v2142_v1, %s1805_s16  ;;  %928 = vrot.lane.b32.xlu1 %v2148_v31, %s1804_s15 }
 0x1dc   : > { %1120 = vrot.lane.b32.xlu0 %v2142_v1, %s1806_s17  ;;  %992 = vrot.lane.b32.xlu1 %v2148_v31, %s1803_s14 }
 0x1e0   : > { %1242 = vrot.lane.b32.xlu0 %v2142_v1, %s1807_s18  ;;  %1057 = vrot.lane.b32.xlu1 %v2148_v31, %s1805_s16 }
 0x1e4   : > { %1307 = vrot.lane.b32.xlu0 %v2142_v1, %s1808_s19  ;;  %1122 = vrot.lane.b32.xlu1 %v2148_v31, %s1806_s17 }
 0x1e8   : > { %1372 = vrot.lane.b32.xlu0 %v2142_v1, %s1809_s20  ;;  %1244 = vrot.lane.b32.xlu1 %v2148_v31, %s1807_s18 }
 0x1ec   : > { %1437 = vrot.lane.b32.xlu0 %v2142_v1, %s1810_s26  ;;  %1309 = vrot.lane.b32.xlu1 %v2148_v31, %s1808_s19  ;;  %s242_s19 = sand.u32 1, %s1792_s22  }
 0x1ed   : > { %s1513_s12 = scalar_lea.sflag [#allocation3], %s242_s19 }
 0x1f0   : > { %923 = vperm.xlu0 %1736, %v920_v32   ;;  %1374 = vrot.lane.b32.xlu1 %v2148_v31, %s1809_s20  ;;  %s1590_s20 = sshll.u32 %s242_s19, 3 }
 0x1f1   : > { %s244_s28 = scalar_lea.vmem [#allocation2], %s1590_s20 }
 0x1f2   : > { %s1527_s29 = sshll.u32 %s244_s28, 4  ;;  %s2305_s29 = int_to_ptr.vmem [resolvable:$true] %s1527_s29 }
 0x1f3   : > { %s1738_s13 = scalar_lea.vmem %s2305_s29, 128 }
 0x1f4   : > { %1439 = vrot.lane.b32.xlu1 %v2148_v31, %s1810_s26  ;;  %s1653_s26 = sshll.u32 %s1868_s25, 7  ;;  %p1739_p11 = scmp.ne.s32.totalorder %s2305_s29, %s1738_s13 }
 0x1f5   : > { %s2303_s11 = scalar_lea.hbm %s2351_s6, %s1653_s26  ;;  %s1811_s25 = smov [#allocation2]  }
 0x1f6   : > { %p1740_p12 = pnand %p1739_p11, %p1885_p5  ;;  %s1742_s14 = sshll.u32 %s1811_s25, 4  ;;  %s1743_s14 = int_to_ptr.vmem [resolvable:$false] %s1742_s14 }
 0x1f7   : > { %s1744_s15 = scalar_lea.vmem %s1743_s14, 256  ;;  %p1745_p0 = scmp.lt.s32.totalorder %s2305_s29, %s1743_s14 }
 0x1f8   : > { %p1741_p13 = pneg %p1740_p12  ;;  %p1746_p1 = scmp.lt.s32.totalorder %s1744_s15, %s1738_s13 }
 0x1fa   : > { %p1747_p2 = por %p1746_p1, %p1745_p0 }
 0x1fc   : > { %p1748_p3 = pnand %p1747_p2, %p1741_p13 }
 0x246   : > { %v927_v33 = vpop.permute.xlu1 %926  ;;  %v991_v34 = vpop.permute.xlu0 %990 }
 0x24a   : > { %v929_v35 = vpop.permute.xlu1 %928  ;;  %v1056_v48 = vpop.permute.xlu0 %1055 }
 0x24b   : > { %v930_v37 = vsel %vm272_vm1, %v927_v33, %v929_v35  ;;  %v931_v38 = vsel %vm272_vm1, %v929_v35, %v927_v33 }
 0x24c   : > { %v932_v39 = vmul.f32 %v931_v38, %v1973_v17  ;;  %v933_v40 = vmul.f32 %v930_v37, %v1976_v18  ;;  %v1194_v37 = vsel %vm293_vm3, %v1188_v30, 0 }
 0x24e   : > { %v993_v43 = vpop.permute.xlu1 %992  ;;  %v937_v6 = vpack.c.bf16 %v933_v40, %v933_v40  ;;  %v936_v45 = vpack.c.bf16 %v932_v39, %v932_v39  ;;  %v1121_v60 = vpop.permute.xlu0 %1120 }
 0x24f   : > { %v994_v46 = vsel %vm347_vm0, %v991_v34, %v993_v43  ;;  %v995_v47 = vsel %vm347_vm0, %v993_v43, %v991_v34 }
 0x250   : > { %v996_v50 = vmul.f32 %v995_v47, %v1967_v15  ;;  %v997_v17 = vmul.f32 %v994_v46, %v1970_v16  ;;  %1621 = vmatprep.subr.msk.bf16.mxu1 %vm293_vm3, %v937_v6  ;;  %v942_v18 = vsel %vm293_vm3, %v936_v45, 0 }
 0x251   : > { %948 = vmatpush1.bf16.msra.mxu1 %v942_v18 }
 0x252   : > { %v1001_v11 = vpack.c.bf16 %v996_v50, %v996_v50  ;;  %v1002_v53 = vpack.c.bf16 %v997_v17, %v997_v17  ;;  %v1058_v54 = vpop.permute.xlu1 %1057  ;;  %v1243_v22 = vpop.permute.xlu0 %1242 }
 0x253   : > { %v1059_v55 = vsel %vm421_vm2, %v1056_v48, %v1058_v54  ;;  %v1060_v57 = vsel %vm421_vm2, %v1058_v54, %v1056_v48 }
 0x254   : > { %v1061_v58 = vmul.f32 %v1060_v57, %v2005_v42  ;;  %v1062_v15 = vmul.f32 %v1059_v55, %v1980_v21  ;;  %1622 = vmatmul.mubr.msk.bf16.vlgmr.msra.gmra.mrb[0].mxu1 %vm289_vm4, %v935_v52  ;;  %1624 = vmatprep.subr.msk.bf16.mxu1 %vm293_vm3, %v1002_v53  ;;  %v1007_v16 = vsel %vm293_vm3, %v1001_v11, 0 }
 0x255   : > { %1013 = vmatpush1.bf16.msra.mxu1 %v1007_v16  ;;  %1044 = vmatprep.mubr.bf16.mxu1 %v1802_v2 }
 0x256   : > { %v1067_v61 = vpack.c.bf16 %v1062_v15, %v1062_v15  ;;  %v1123_v62 = vpop.permute.xlu1 %1122  ;;  %v1066_v21 = vpack.c.bf16 %v1061_v58, %v1061_v58  ;;  %v1308_v33 = vpop.permute.xlu0 %1307 }
 0x257   : > { %v1124_v42 = vsel %vm495_vm5, %v1121_v60, %v1123_v62  ;;  %v1125_v8 = vsel %vm495_vm5, %v1123_v62, %v1121_v60 }
 0x258   : > { %v1127_v63 = vmul.f32 %v1124_v42, %v2016_v49  ;;  %1627 = vmatprep.subr.msk.bf16.mxu1 %vm293_vm3, %v1067_v61  ;;  %v1126_v13 = vmul.f32 %v1125_v8, %v2026_v56  ;;  %v1072_v3 = vsel %vm293_vm3, %v1066_v21, 0  ;;  %v1626_v49 = vld [vmem:[%s2348_s3 + $0x8] sm:$0xf]  ;;  %v1641_v61 = vld [vmem:[%s2348_s3 + $0x1c] sm:$0xf] }
 0x259   : > { %v1065_v19 = vpack.c.bf16 %v1626_v49, %v1626_v49  ;;  %v1382_v62 = vpack.c.bf16 %v1641_v61, %v1641_v61 }
 0x25a   : > { %v1132_v9 = vpack.c.bf16 %v1127_v63, %v1127_v63  ;;  %v1131_v14 = vpack.c.bf16 %v1126_v13, %v1126_v13  ;;  %v1245_v20 = vpop.permute.xlu1 %1244  ;;  %v1373_v43 = vpop.permute.xlu0 %1372 }
 0x25b   : > { %v1247_v25 = vsel %vm626_vm6, %v1245_v20, %v1243_v22  ;;  %v1246_v31 = vsel %vm626_vm6, %v1243_v22, %v1245_v20 }
 0x25c   : > { %1625 = vmatmul.mubr.msk.bf16.vlgmr.msra.gmra.mrb[4].mxu1 %vm289_vm4, %v1000_v5  ;;  %v1137_v56 = vsel %vm293_vm3, %v1131_v14, 0  ;;  %v1249_v27 = vmul.f32 %v1247_v25, %v2046_v12  ;;  %v1248_v34 = vmul.f32 %v1246_v31, %v2058_v23  ;;  %v1632_v12 = vld [vmem:[%s2348_s3 + $0x10] sm:$0xf] }
 0x25d   : > { %1078 = vmatpush1.bf16.msra.mxu1 %v1072_v3  ;;  %1109 = vmatprep.mubr.bf16.mxu1 %v1802_v2  ;;  %v1187_v39 = vpack.c.bf16 %v1632_v12, %v1632_v12 }
 0x25e   : > { %1630 = vmatprep.subr.msk.bf16.mxu1 %vm293_vm3, %v1132_v9  ;;  %v1310_v32 = vpop.permute.xlu1 %1309  ;;  %v1254_v35 = vpack.c.bf16 %v1249_v27, %v1249_v27  ;;  %v1253_v1 = vpack.c.bf16 %v1248_v34, %v1248_v34  ;;  %v1438_v52 = vpop.permute.xlu0 %1437 }
 0x25f   : > { %v1312_v38 = vsel %vm700_vm7, %v1310_v32, %v1308_v33  ;;  %v1311_v40 = vsel %vm700_vm7, %v1308_v33, %v1310_v32 }
 0x260   : > { %v1314_v23 = vmul.f32 %v1312_v38, %v2069_v29  ;;  %v1313_v6 = vmul.f32 %v1311_v40, %v2079_v36  ;;  %v1259_v46 = vsel %vm293_vm3, %v1253_v1, 0  ;;  %v1635_v29 = vld [vmem:[%s2348_s3 + $0x14] sm:$0xf] }
 0x261   : > { %v1252_v50 = vpack.c.bf16 %v1635_v29, %v1635_v29 }
 0x262   : > { %v1375_v41 = vpop.permute.xlu1 %1374  ;;  %v1319_v45 = vpack.c.bf16 %v1314_v23, %v1314_v23  ;;  %v1318_v48 = vpack.c.bf16 %v1313_v6, %v1313_v6 }
 0x263   : > { %v1377_v47 = vsel %vm774_vm8, %v1375_v41, %v1373_v43  ;;  %v1376_v17 = vsel %vm774_vm8, %v1373_v43, %v1375_v41 }
 0x264   : > { %1628 = vmatmul.mubr.msk.bf16.vlgmr.msra.gmra.mrb[8].mxu1 %vm289_vm4, %v1065_v19  ;;  %v1379_v36 = vmul.f32 %v1377_v47, %v2090_v44  ;;  %v1378_v11 = vmul.f32 %v1376_v17, %v2100_v51  ;;  %v1324_v54 = vsel %vm293_vm3, %v1318_v48, 0  ;;  %v1638_v44 = vld [vmem:[%s2348_s3 + $0x18] sm:$0xf] }
 0x265   : > { %1143 = vmatpush1.bf16.msra.mxu1 %v1137_v56  ;;  %1174 = vmatprep.mubr.bf16.mxu1 %v1802_v2  ;;  %v1317_v58 = vpack.c.bf16 %v1638_v44, %v1638_v44 }
 0x266   : > { %1633 = vmatprep.subr.msk.bf16.mxu1 %vm293_vm3, %v1189_v24  ;;  %v1440_v18 = vpop.permute.xlu1 %1439  ;;  %v1384_v53 = vpack.c.bf16 %v1379_v36, %v1379_v36  ;;  %v1383_v57 = vpack.c.bf16 %v1378_v11, %v1378_v11 }
 0x267   : > { %v1442_v55 = vsel %vm848_vm9, %v1440_v18, %v1438_v52  ;;  %v1441_v15 = vsel %vm848_vm9, %v1438_v52, %v1440_v18 }
 0x268   : > { %v1444_v51 = vmul.f32 %v2112_v10, %v1442_v55  ;;  %v1443_v16 = vmul.f32 %v2124_v4, %v1441_v15  ;;  %v1389_v60 = vsel %vm293_vm3, %v1383_v57, 0  ;;  %v1644_v4 = vld [vmem:[%s2348_s3 + $0x20] sm:$0xf]  ;;  %v1503_v57 = vcombine.high %v1900_v0, %v1900_v0 }
 0x269   : > { %v1447_v42 = vpack.c.bf16 %v1644_v4, %v1644_v4 }
 0x26a   : > { %v1449_v59 = vpack.c.bf16 %v1444_v51, %v1444_v51  ;;  %v1448_v10 = vpack.c.bf16 %v1443_v16, %v1443_v16 }
 0x26c   : > { %1631 = vmatmul.mubr.msk.bf16.vlgmr.msra.gmra.mrb[12].mxu1 %vm289_vm4, %v1130_v28  ;;  %v1454_v7 = vsel %vm293_vm3, %v1448_v10, 0 }
 0x26d   : > { %1200 = vmatpush1.bf16.msra.mxu1 %v1194_v37  ;;  %1231 = vmatprep.mubr.bf16.mxu1 %v1802_v2 }
 0x26e   : > { %1636 = vmatprep.subr.msk.bf16.mxu1 %vm293_vm3, %v1254_v35 }
 0x26f   : > { %v924_v9 = vpop.permute.xlu0 %923 }
 0x274   : > { %1634 = vmatmul.mubr.msk.bf16.vlgmr.msra.gmra.mrb[16].mxu1 %vm289_vm4, %v1187_v39 }
 0x275   : > { %1265 = vmatpush1.bf16.msra.mxu1 %v1259_v46  ;;  %1296 = vmatprep.mubr.bf16.mxu1 %v1802_v2 }
 0x276   : > { %1639 = vmatprep.subr.msk.bf16.mxu1 %vm293_vm3, %v1319_v45 }
 0x27c   : > { %1637 = vmatmul.mubr.msk.bf16.vlgmr.msra.gmra.mrb[20].mxu1 %vm289_vm4, %v1252_v50 }
 0x27d   : > { %1330 = vmatpush1.bf16.msra.mxu1 %v1324_v54  ;;  %1361 = vmatprep.mubr.bf16.mxu1 %v1802_v2 }
 0x27e   : > { %1642 = vmatprep.subr.msk.bf16.mxu1 %vm293_vm3, %v1384_v53 }
 0x284   : > { %1640 = vmatmul.mubr.msk.bf16.vlgmr.msra.gmra.mrb[24].mxu1 %vm289_vm4, %v1317_v58 }
 0x285   : > { %1395 = vmatpush1.bf16.msra.mxu1 %v1389_v60  ;;  %1426 = vmatprep.mubr.bf16.mxu1 %v1802_v2 }
 0x286   : > { %1645 = vmatprep.subr.msk.bf16.mxu1 %vm293_vm3, %v1449_v59 }
 0x28c   : > { %1643 = vmatmul.mubr.msk.bf16.vlgmr.msra.gmra.mrb[28].mxu1 %vm289_vm4, %v1382_v62 }
 0x28d   : > { %1460 = vmatpush1.bf16.msra.mxu1 %v1454_v7  ;;  %1491 = vmatprep.mubr.bf16.mxu1 %v1802_v2 }
 0x294   : > { %1646 = vmatmul.mubr.msk.bf16.vlgmr.msra.gmra.mrb[32].mxu1 %vm289_vm4, %v1447_v42 }
 0x327   : > { %v981_v21 = vpop.f32.mrb[0].mxu1 }
 0x328   : > { %v983_v63 = vpop.f32.mrb[1].mxu1  ;;  %v988_v13 = vadd.f32 %v981_v21, %v924_v9 }
 0x329   : > { %v985_v5 = vpop.f32.mrb[2].mxu1  ;;  %v989_v3 = vadd.f32 %v983_v63, %v924_v9 }
 0x32a   : > { %v986_v8 = vpop.f32.mrb[3].mxu1 }
 0x32f   : > { %v1046_v49 = vpop.f32.mrb[4].mxu1 }
 0x330   : > { %v1053_v14 = vadd.f32 %v1046_v49, %v988_v13  ;;  %v1048_v19 = vpop.f32.mrb[5].mxu1 }
 0x331   : > { %v1054_v20 = vadd.f32 %v1048_v19, %v989_v3  ;;  %v1050_v22 = vpop.f32.mrb[6].mxu1 }
 0x332   : > { %v1051_v2 = vpop.f32.mrb[7].mxu1 }
 0x337   : > { %v1111_v56 = vpop.f32.mrb[8].mxu1 }
 0x338   : > { %v1118_v24 = vadd.f32 %v1111_v56, %v1053_v14  ;;  %v1113_v25 = vpop.f32.mrb[9].mxu1 }
 0x339   : > { %v1119_v26 = vadd.f32 %v1113_v25, %v1054_v20  ;;  %v1115_v27 = vpop.f32.mrb[10].mxu1 }
 0x33a   : > { %v1116_v28 = vpop.f32.mrb[11].mxu1 }
 0x33f   : > { %v1176_v30 = vpop.f32.mrb[12].mxu1 }
 0x340   : > { %v1183_v31 = vadd.f32 %v1176_v30, %v1118_v24  ;;  %v1178_v32 = vpop.f32.mrb[13].mxu1 }
 0x341   : > { %v1184_v33 = vadd.f32 %v1178_v32, %v1119_v26  ;;  %v1180_v34 = vpop.f32.mrb[14].mxu1 }
 0x342   : > { %v1181_v35 = vpop.f32.mrb[15].mxu1 }
 0x347   : > { %v1233_v37 = vpop.f32.mrb[16].mxu1 }
 0x348   : > { %v1240_v38 = vadd.f32 %v1233_v37, %v1183_v31  ;;  %v1235_v12 = vpop.f32.mrb[17].mxu1 }
 0x349   : > { %v1241_v1 = vadd.f32 %v1235_v12, %v1184_v33  ;;  %v1237_v23 = vpop.f32.mrb[18].mxu1 }
 0x34a   : > { %v1238_v39 = vpop.f32.mrb[19].mxu1 }
 0x34f   : > { %v1298_v40 = vpop.f32.mrb[20].mxu1 }
 0x350   : > { %v1305_v41 = vadd.f32 %v1298_v40, %v1240_v38  ;;  %v1300_v43 = vpop.f32.mrb[21].mxu1 }
 0x351   : > { %v1306_v6 = vadd.f32 %v1300_v43, %v1241_v1  ;;  %v1302_v45 = vpop.f32.mrb[22].mxu1 }
 0x352   : > { %v1303_v46 = vpop.f32.mrb[23].mxu1 }
 0x357   : > { %v1363_v47 = vpop.f32.mrb[24].mxu1 }
 0x358   : > { %v1370_v29 = vadd.f32 %v1363_v47, %v1305_v41  ;;  %v1365_v48 = vpop.f32.mrb[25].mxu1 }
 0x359   : > { %v1371_v36 = vadd.f32 %v1365_v48, %v1306_v6  ;;  %v1367_v50 = vpop.f32.mrb[26].mxu1 }
 0x35a   : > { %v1368_v17 = vpop.f32.mrb[27].mxu1 }
 0x35f   : > { %v1428_v18 = vpop.f32.mrb[28].mxu1 }
 0x360   : > { %v1435_v52 = vadd.f32 %v1428_v18, %v1370_v29  ;;  %v1430_v11 = vpop.f32.mrb[29].mxu1 }
 0x361   : > { %v1436_v53 = vadd.f32 %v1430_v11, %v1371_v36  ;;  %v1432_v54 = vpop.f32.mrb[30].mxu1 }
 0x362   : > { %v1433_v55 = vpop.f32.mrb[31].mxu1 }
 0x367   : > { %v1493_v44 = vpop.f32.mrb[32].mxu1 }
 0x368   : > { %v1500_v51 = vadd.f32 %v1493_v44, %v1435_v52  ;;  %v1495_v58 = vpop.f32.mrb[33].mxu1 }
 0x369   : > { %v1501_v15 = vadd.f32 %v1495_v58, %v1436_v53  ;;  %v1497_v16 = vpop.f32.mrb[34].mxu1 }
 0x36a   : > { %v1505_v59 = vadd.f32 %v1500_v51, %v1900_v0  ;;  %v1498_v60 = vpop.f32.mrb[35].mxu1 }
 0x36b   : > { %v1506_v61 = vadd.f32 %v1503_v57, %v1501_v15 }
 0x36d   : > { %v1509_v10 = vcombine.low %v1505_v59, %v1506_v61 }
 0x36f   : > { %1511 = vst [vmem:[%s244_s28] sm:$0xff] %v1509_v10 }
 0x370   : > { %1751 = shalt.err (!%p1748_p3)
}
 0x371   : > { %s1752_s16 = scalar_lea.hbm %s2303_s11, 128  ;;  %s1756_s19 = scalar_lea.hbm %s2351_s6, 256 }
 0x372   : > { %p1753_p4 = scmp.ne.s32.totalorder %s2303_s11, %s1752_s16  ;;  %p1757_p9 = scmp.lt.u32.totalorder %s2303_s11, %s2351_s6 }
 0x373   : > { %p1758_p10 = scmp.lt.u32.totalorder %s1756_s19, %s1752_s16  ;;  %p1760_p12 = scmp.lt.u32.totalorder %s1752_s16, %s2303_s11 }
 0x374   : > { %p1754_p7 = pnand %p1753_p4, %p1885_p5 }
 0x375   : > { %p1759_p11 = por %p1758_p10, %p1757_p9 }
 0x376   : > { %p1755_p8 = pneg %p1754_p7 }
 0x377   : > { %p1761_p13 = por %p1760_p12, %p1759_p11 }
 0x379   : > { %p1762_p0 = pnand %p1761_p13, %p1755_p8 }
 0x37b   : > { %1765 = shalt.err (!%p1762_p0)
}
 0x37c   : > { %1688 = dma.vmem_to_hbm [thread:$0]  (%p1885_p5), %s2305_s29, 128, %s2303_s11, %s1513_s12  }
 0x37d PF: > { %p1694_p1 = scmp.ge.s32.totalorder %s1800_s24, 2  ;;  %s1539_s28 = sand.u32 1, %s1788_s21  }
 0x37e   : > { %s1540_s9 = scalar_lea.sflag [#allocation3], %s1539_s28 }
 0x37f   : > { %p1691_p2 = pnand %p1694_p1, %p1889_p6 }
 0x381   : > { %1783 = dma.done.wait (!%p1691_p2), %s1540_s9, 128  }
 0x382   : > { %1785 = vsyncadd (!%p1691_p2), %s1540_s9, 4294967168  ;;  %p16_p3 = scmp.ge.s32.totalorder %s1872_s27, 4   ;;  %s2354_s21 = smov %s1792_s22 }
 0x383   : > { %s2355_s22 = smov %s1796_s23  ;;  %s2356_s23 = smov %s1883_s30 }
 0x384   : > { %s2357_s24 = smov %s1872_s27  ;;  %18 = sbr.rel (!%p16_p3) target bundleno = 3 (0x3), region = 95 }
 0x38b   :  { %1545 = vsyncpa [#allocation3], 1 }
 0x38c   :  { %1547 = vsyncpa [#allocation3 + $0x1], 1 }

</bundles_post_ra>
